<compile_context>
chip_gen: v7x
topology: tpu7x:2x2x1
jax: 0.10.0
libtpu: 0.0.40
codegen_flags: <defaults>
</compile_context>

<pallas_src>
from functools import partial

import numpy as np
import jax
import jax.numpy as jnp
from jax import lax
from jax.experimental import pallas as pl
from jax.experimental.pallas import tpu as pltpu


# ----------------------------- fused Pallas kernel ---------------------------

def _classifier_kernel(targets_ref, scores_ref, o_ref, *, n_targets, batch, tile_b):
    """One grid step == one 128-wide batch tile (batch mapped to lanes).

    targets_ref : SMEM (B*T,) int32    (scalar prefetch, flattened)
    scores_ref  : SMEM (V,)   float32  (folded per-vocab scores, b_eff included)
    o_ref       : VMEM (1, tile_b) f32 (lane-dense batch tile of outputs)
    """
    tile = pl.program_id(0)
    lane = lax.broadcasted_iota(jnp.int32, (1, tile_b), 1)

    def accumulate(b_local, acc):
        b = tile * tile_b + b_local
        hit = lane == b_local
        # T broadcast-adds of SMEM scalars into lane b_local of the accumulator.
        for t in range(n_targets):                         # static trip count
            s = scores_ref[targets_ref[b * n_targets + t]]
            acc = jnp.where(hit, acc + s, acc)
        return acc

    # Only iterate over the valid batches of this tile; padded lanes stay 0 and
    # are sliced off in the wrapper.
    n_valid = jnp.minimum(tile_b, batch - tile * tile_b)
    row = lax.fori_loop(0, n_valid, accumulate,
                        jnp.zeros((1, tile_b), jnp.float32))
    o_ref[...] = row * (1.0 / n_targets)                   # unmasked (1,128) store


# ----------------------- host-side one-time weight fold ----------------------

def _build_pool_matrix(seq_len, heads, head_dim):
    """(D, D) matrix P with  mean_s( h.reshape(S, heads*hd)[s] ) == v_full @ P,
    where h[head, s, :] = v_full[head*hd:(head+1)*hd]  (broadcast over s).
    Encodes torch's raw (heads, S, hd) -> (S, heads*hd) reshape + mean(dim=1)."""
    D = heads * head_dim
    src = np.broadcast_to(
        np.arange(D, dtype=np.int64).reshape(heads, 1, head_dim),
        (heads, seq_len, head_dim)).reshape(seq_len, D)
    P = np.zeros((D, D), dtype=np.float64)
    cols = np.arange(D)
    for s in range(seq_len):
        np.add.at(P, (src[s], cols), 1.0 / seq_len)
    return P


def prepare_kernel_params(params, *, heads, seq_len):
    """Fold the entire post-gather forward into a per-vocab score vector (exact).

    out[b] = mean_t emb_w[targets[b,t]] @ w_eff + b_eff = mean_t scores[targets[b,t]]
    with w_eff = wv_bd @ pool @ fc_w.T.  The Q/K/mask/softmax path is inert because
    softmax over the singleton target axis is identically 1 (see module TODO)."""
    emb_w = np.asarray(params["emb_w"], np.float64)
    V, D = emb_w.shape
    hd = D // heads
    assert D == heads * hd, "word dim must be divisible by heads"

    v_w = np.asarray(params["v_w"], np.float64)            # (hd, hd) torch Linear layout
    v_b = np.asarray(params["v_b"], np.float64)            # (hd,)
    fc_w = np.asarray(params["fc_w"], np.float64)          # (1, D)
    fc_b = np.asarray(params["fc_b"], np.float64)          # (1,)

    wv_bd = np.kron(np.eye(heads), v_w.T)                  # (D, D) block-diag per-head values
    bv = np.tile(v_b, heads)                               # (D,)
    pool = _build_pool_matrix(seq_len, heads, hd)          # (D, D) scrambled-reshape + mean

    w_eff = wv_bd @ pool @ fc_w.T                          # (D, 1)
    b_eff = (bv @ pool @ fc_w.T + fc_b).item()             # scalar
    # Fold b_eff into every score: mean_t(x_t + c) == mean_t(x_t) + c  (exact).
    scores = (emb_w @ w_eff).reshape(-1) + b_eff           # (V,)
    return {"scores": jnp.asarray(scores, jnp.float32)}


# ------------------------------ forward pass ---------------------------------

_TILE_B = 128   # batch lanes per grid step (lane-dense output blocks)


def classifier_forward(prep, hidden, masks, targets):
    """Fused Pallas forward.  `hidden` (BERT last_hidden_state) and `masks` are
    accepted for API parity with Classifier.forward but are provably inert in the
    target=True branch (softmax over a singleton key axis == 1) — see TODO."""
    del hidden, masks
    B, T = targets.shape
    n_tiles = pl.cdiv(B, _TILE_B)
    Bp = n_tiles * _TILE_B

    kernel = partial(_classifier_kernel, n_targets=T, batch=B, tile_b=_TILE_B)
    grid_spec = pltpu.PrefetchScalarGridSpec(
        num_scalar_prefetch=1,                 # flattened targets -> SMEM
        grid=(n_tiles,),
        in_specs=[
            # (V,) folded score vector lives in SMEM: V*4 bytes, scalar-indexed.
            # TODO(synk): for a vocabulary too large for SMEM, fall back to the
            # w_eff-level fold (emb table in VMEM/HBM + one (TB,D)x(D,1) dot).
            pl.BlockSpec(memory_space=pltpu.MemorySpace.SMEM),
        ],
        out_specs=pl.BlockSpec((1, _TILE_B), lambda i, tgt_ref: (0, i)),
    )
    out = pl.pallas_call(
        kernel,
        grid_spec=grid_spec,
        out_shape=jax.ShapeDtypeStruct((1, Bp), jnp.float32),
        compiler_params=pltpu.CompilerParams(
            dimension_semantics=("parallel",)),   # batch tiles are independent
    )(targets.reshape(-1).astype(jnp.int32), prep["scores"])
    return out[0, :B].reshape(B, 1)


# --------------------------- pure-JAX reference -------------------------------
# Literal transcription of the PyTorch module (including the dead Q/K/mask path).

def reference_forward(params, hidden, masks, targets, *, heads=10):
    B, S, H = hidden.shape
    emb_w = params["emb_w"]
    V, D = emb_w.shape
    hd = D // heads
    we = hidden @ params["tfc_w"].T + params["tfc_b"]                       # (B,S,D)
    tgt = jnp.mean(emb_w[targets], axis=1, keepdims=True)                   # (B,1,D)
    Q = we.reshape(B, -1, heads, hd) @ params["q_w"].T + params["q_b"]
    K = tgt.reshape(B, -1, heads, hd) @ params["k_w"].T + params["k_b"]
    Vv = tgt.reshape(B, -1, heads, hd) @ params["v_w"].T + params["v_b"]
    dot = jnp.matmul(Q.reshape(B, heads, Q.shape[1], hd),
                     K.reshape(B, heads, hd, K.shape[1]))
    m = masks.reshape(B, 1, Q.shape[1], 1)
    dot = jnp.where(m == 0, 0.0, dot)
    div = dot / (D ** 0.5)
    a = jax.nn.softmax(div, axis=-1)
    h = jnp.matmul(a.reshape(B, heads, Q.shape[1], Vv.shape[1]),
                   Vv.reshape(B, heads, Vv.shape[1], hd))
    we2 = h.reshape(B, -1, heads * hd)
    return jnp.mean(we2, axis=1) @ params["fc_w"].T + params["fc_b"]


# ----------------------------------- main -------------------------------------

if __name__ == "__main__":
    B, S, H, T, V, heads = 2, 8, 32, 4, 16, 10
    D = 80                      # word_dim (weights.shape[1]); head_dim = 8
    hd = D // heads

    key = jax.random.PRNGKey(0)
    ks = jax.random.split(key, 14)
    params = {
        "emb_w": 0.1 * jax.random.normal(ks[0], (V, D), jnp.float32),
        "tfc_w": 0.1 * jax.random.normal(ks[1], (D, H), jnp.float32),
        "tfc_b": 0.1 * jax.random.normal(ks[2], (D,), jnp.float32),
        "q_w":   0.1 * jax.random.normal(ks[3], (hd, hd), jnp.float32),
        "q_b":   0.1 * jax.random.normal(ks[4], (hd,), jnp.float32),
        "k_w":   0.1 * jax.random.normal(ks[5], (hd, hd), jnp.float32),
        "k_b":   0.1 * jax.random.normal(ks[6], (hd,), jnp.float32),
        "v_w":   0.1 * jax.random.normal(ks[7], (hd, hd), jnp.float32),
        "v_b":   0.1 * jax.random.normal(ks[8], (hd,), jnp.float32),
        "fc_w":  0.1 * jax.random.normal(ks[9], (1, D), jnp.float32),
        "fc_b":  0.1 * jax.random.normal(ks[10], (1,), jnp.float32),
    }
    hidden = jax.random.normal(ks[11], (B, S, H), jnp.float32)   # stand-in for BERT
    masks = (jax.random.uniform(ks[12], (B, S)) > 0.2).astype(jnp.float32)
    targets = jax.random.randint(ks[13], (B, T), 0, V)

    prep = prepare_kernel_params(params, heads=heads, seq_len=S)
    out = jax.jit(classifier_forward)(prep, hidden, masks, targets)
    out = jax.block_until_ready(out)

    ref = reference_forward(params, hidden, masks, targets, heads=heads)
    assert out.shape == (B, 1), out.shape
    assert jnp.allclose(out, ref, atol=1e-3, rtol=1e-3), (out, ref)
    print("KERNEL_OK")
</pallas_src>

<mosaic_0001>
module attributes {stable_mosaic.version = 11 : i64} {
  func.func @_classifier_kernel(%arg0: i32, %arg1: memref<8xi32, #tpu.memory_space<smem>>, %arg2: memref<16xf32, #tpu.memory_space<smem>>, %arg3: memref<1x128xf32, #tpu.memory_space<vmem>>) attributes {dimension_semantics = [#tpu.dimension_semantics<parallel>], iteration_bounds = array<i64: 1>, scalar_prefetch = 1 : i64, scratch_operands = 0 : i64, tpu.core_type = #tpu.core_type<tc>, window_params = [{transform_indices = @transform_0, window_bounds = array<i64: 16>}, {transform_indices = @transform_1, window_bounds = array<i64: 1, 128>}]} {
    %0 = tpu.iota {dimensions = array<i32: 1>} : vector<1x128xi32>
    %c128_i32 = arith.constant 128 : i32
    %1 = arith.muli %arg0, %c128_i32 : i32
    %c2_i32 = arith.constant 2 : i32
    %2 = arith.subi %c2_i32, %1 : i32
    %c128_i32_0 = arith.constant 128 : i32
    %3 = arith.minsi %c128_i32_0, %2 : i32
    %cst = arith.constant 0.000000e+00 : f32
    %4 = vector.broadcast %cst : f32 to vector<1x128xf32>
    %c0_i32 = arith.constant 0 : i32
    %5 = arith.subi %3, %c0_i32 : i32
    %6 = arith.addi %c0_i32, %5 : i32
    %c1_i32 = arith.constant 1 : i32
    %7 = scf.for %arg4 = %c0_i32 to %6 step %c1_i32 iter_args(%arg5 = %4) -> (vector<1x128xf32>)  : i32 {
      %c128_i32_3 = arith.constant 128 : i32
      %11 = arith.muli %arg0, %c128_i32_3 : i32
      %12 = arith.addi %11, %arg4 : i32
      %13 = vector.broadcast %arg4 : i32 to vector<1x128xi32>
      %14 = arith.cmpi eq, %0, %13 : vector<1x128xi32>
      %c4_i32 = arith.constant 4 : i32
      %15 = arith.muli %12, %c4_i32 : i32
      %c0_i32_4 = arith.constant 0 : i32
      %16 = arith.addi %15, %c0_i32_4 : i32
      %17 = arith.index_cast %16 : i32 to index
      %18 = memref.load %arg1[%17] : memref<8xi32, #tpu.memory_space<smem>>
      %19 = arith.index_cast %18 : i32 to index
      %20 = memref.load %arg2[%19] : memref<16xf32, #tpu.memory_space<smem>>
      %21 = vector.broadcast %20 : f32 to vector<1x128xf32>
      %22 = arith.addf %arg5, %21 : vector<1x128xf32>
      %23 = arith.select %14, %22, %arg5 : vector<1x128xi1>, vector<1x128xf32>
      %c4_i32_5 = arith.constant 4 : i32
      %24 = arith.muli %12, %c4_i32_5 : i32
      %c1_i32_6 = arith.constant 1 : i32
      %25 = arith.addi %24, %c1_i32_6 : i32
      %26 = arith.index_cast %25 : i32 to index
      %27 = memref.load %arg1[%26] : memref<8xi32, #tpu.memory_space<smem>>
      %28 = arith.index_cast %27 : i32 to index
      %29 = memref.load %arg2[%28] : memref<16xf32, #tpu.memory_space<smem>>
      %30 = vector.broadcast %29 : f32 to vector<1x128xf32>
      %31 = arith.addf %23, %30 : vector<1x128xf32>
      %32 = arith.select %14, %31, %23 : vector<1x128xi1>, vector<1x128xf32>
      %c4_i32_7 = arith.constant 4 : i32
      %33 = arith.muli %12, %c4_i32_7 : i32
      %c2_i32_8 = arith.constant 2 : i32
      %34 = arith.addi %33, %c2_i32_8 : i32
      %35 = arith.index_cast %34 : i32 to index
      %36 = memref.load %arg1[%35] : memref<8xi32, #tpu.memory_space<smem>>
      %37 = arith.index_cast %36 : i32 to index
      %38 = memref.load %arg2[%37] : memref<16xf32, #tpu.memory_space<smem>>
      %39 = vector.broadcast %38 : f32 to vector<1x128xf32>
      %40 = arith.addf %32, %39 : vector<1x128xf32>
      %41 = arith.select %14, %40, %32 : vector<1x128xi1>, vector<1x128xf32>
      %c4_i32_9 = arith.constant 4 : i32
      %42 = arith.muli %12, %c4_i32_9 : i32
      %c3_i32 = arith.constant 3 : i32
      %43 = arith.addi %42, %c3_i32 : i32
      %44 = arith.index_cast %43 : i32 to index
      %45 = memref.load %arg1[%44] : memref<8xi32, #tpu.memory_space<smem>>
      %46 = arith.index_cast %45 : i32 to index
      %47 = memref.load %arg2[%46] : memref<16xf32, #tpu.memory_space<smem>>
      %48 = vector.broadcast %47 : f32 to vector<1x128xf32>
      %49 = arith.addf %41, %48 : vector<1x128xf32>
      %50 = arith.select %14, %49, %41 : vector<1x128xi1>, vector<1x128xf32>
      scf.yield %50 : vector<1x128xf32>
    }
    %cst_1 = arith.constant 2.500000e-01 : f32
    %8 = vector.broadcast %cst_1 : f32 to vector<1x128xf32>
    %9 = arith.mulf %7, %8 : vector<1x128xf32>
    %c0 = arith.constant 0 : index
    %c0_2 = arith.constant 0 : index
    %10 = vector.load %arg3[%c0, %c0_2] : memref<1x128xf32, #tpu.memory_space<vmem>>, vector<1x128xf32>
    tpu.vector_store %arg3[%c0, %c0_2], %9 {strides = array<i32>} : memref<1x128xf32, #tpu.memory_space<vmem>>, vector<1x128xf32>,
    return
  }
  func.func @transform_0(%arg0: i32, %arg1: memref<8xi32, #tpu.memory_space<smem>>) -> i32 {
    %c0_i32 = arith.constant 0 : i32
    %c0_i32_0 = arith.constant 0 : i32
    return %c0_i32 : i32
  }
  func.func @transform_1(%arg0: i32, %arg1: memref<8xi32, #tpu.memory_space<smem>>) -> (i32, i32) {
    %c0_i32 = arith.constant 0 : i32
    %c0_i32_0 = arith.constant 0 : i32
    return %c0_i32, %arg0 : i32, i32
  }
}

</mosaic_0001>

<bundles_post_ra>
// kernel: classifier_forward.1
= control target key start
LH: loop header
LB: loop body
LE: loop exit
PB: predicated region body
PF: predicated region fallthrough
CT: control target
= control target key end

     0   :  { %s182_s0 = inlined_call_operand.vmem [shape: s32[8], index: 0, kind: input, shape index: {}]   ;;  %s183_s1 = inlined_call_operand.vmem [shape: f32[16], index: 1, kind: input, shape index: {}]   ;;  %s184_s2 = inlined_call_operand.vmem [shape: f32[1,128], index: 2, kind: output, shape index: {}]  }
   0x1   :  { %s7_s11 = sshll.u32 %s182_s0, 4  ;;  %s8_s11 = int_to_ptr.vmem [resolvable:$true] %s7_s11 }
   0x2   :  { %s102_s12 = scalar_lea.vmem %s8_s11, 16  ;;  %p107_p1 = scmp.lt.s32.totalorder %s8_s11, %s8_s11 }
   0x3   :  { %p103_p0 = scmp.ne.s32.totalorder %s8_s11, %s102_s12  ;;  %p108_p2 = scmp.lt.s32.totalorder %s102_s12, %s102_s12 }
   0x5   :  { %p109_p3 = por %p108_p2, %p107_p1 }
   0x7   :  { %p110_p4 = pnand %p109_p3, %p103_p0 }
   0x9   :  { %113 = shalt.err (!%p110_p4)  }
   0xa   :  { %s146_s13 = smov [#allocation3]  }
   0xb   :  { %10 = dma.vmem_to_smem %s8_s11, 16, %s146_s13, [#allocation2] }
   0xc   :  { %134 = dma.done.wait [#allocation2], 16 }
   0xd   :  { %135 = vsyncadd [#allocation2], 4294967280 }
   0xe   :  { %12 = sfence }
   0xf   :  { %13 = vsyncpa [#allocation5], 0  ;;  %s20_s16 = sshll.u32 %s183_s1, 4  ;;  %s21_s16 = int_to_ptr.vmem [resolvable:$true] %s20_s16 }
  0x10   :  { %s114_s0 = scalar_lea.vmem %s21_s16, 16  ;;  %p119_p6 = scmp.lt.s32.totalorder %s21_s16, %s21_s16 }
  0x11   :  { %p115_p5 = scmp.ne.s32.totalorder %s21_s16, %s114_s0  ;;  %p120_p7 = scmp.lt.s32.totalorder %s114_s0, %s114_s0 }
  0x13   :  { %p121_p8 = por %p120_p7, %p119_p6 }
  0x15   :  { %p122_p9 = pnand %p121_p8, %p115_p5 }
  0x17   :  { %125 = shalt.err (!%p122_p9)
}
  0x18   :  { %s147_s17 = smov [#allocation4]  }
  0x19   :  { %23 = dma.vmem_to_smem %s21_s16, 16, %s147_s17, [#allocation5]  }
  0x1a   :  { %136 = dma.done.wait [#allocation5], 16  }
  0x1b   :  { %137 = vsyncadd [#allocation5], 4294967280 }
  0x1c   :  { %27 = sfence }
  0x1d   :  { %v28_v0 = vlaneseq  ;;  %v138_v2 = vmov 0.0   ;;  %s169_s18 = smov 0  }
  0x1f   :  { %v29_v1 = vand.u32 127, %v28_v0 }
  0x20 LB: > { %s83_s1 = sshll.u32 %s144_s18, 2  ;;  %v42_v3 = vstv %s144_s18  ;;  %s37_s18 = sadd.s32 1, %s144_s18   ;;  %s144_s18 = sphi %s169_s18, %s37_s18   ;;  %v140_v2 = vphi %v138_v2, %v139_v2  }
  0x21   : > { %s45_s19 = sld [smem:[#allocation3 + %s83_s1]]  ;;  %s50_s20 = sadd.s32 1, %s83_s1  ;;  %vm43_vm0 = vcmp.eq.s32.totalorder %v29_v1, %v42_v3 }
  0x22   : > { %s51_s21 = sld [smem:[#allocation3 + %s50_s20]]  ;;  %s56_s22 = sadd.s32 2, %s83_s1 }
  0x23   : > { %s57_s23 = sld [smem:[#allocation3 + %s56_s22]]  ;;  %s62_s24 = sadd.s32 3, %s83_s1 }
  0x24   : > { %s63_s25 = sld [smem:[#allocation3 + %s62_s24]]  ;;  %p36_p10 = scmp.ge.s32.totalorder %s37_s18, 2 }
  0x27   : > { %s46_s26 = sld [smem:[#allocation4 + %s45_s19]] }
  0x28   : > { %s52_s27 = sld [smem:[#allocation4 + %s51_s21]] }
  0x29   : > { %s58_s28 = sld [smem:[#allocation4 + %s57_s23]] }
  0x2a   : > { %s64_s29 = sld [smem:[#allocation4 + %s63_s25]] }
  0x2d   : > { %v47_v4 = vstv %s46_s26 }
  0x2e   : > { %v48_v5 = vadd.f32 %v140_v2, %v47_v4  ;;  %v53_v6 = vstv %s52_s27 }
  0x2f   : > { %v59_v9 = vstv %s58_s28 }
  0x30   : > { %v49_v7 = vsel %vm43_vm0, %v48_v5, %v140_v2  ;;  %v65_v12 = vstv %s64_s29 }
  0x31   : > { %v54_v8 = vadd.f32 %v53_v6, %v49_v7 }
  0x33   : > { %v55_v10 = vsel %vm43_vm0, %v54_v8, %v140_v2 }
  0x34   : > { %v60_v11 = vadd.f32 %v59_v9, %v55_v10  ;;  %39 = sbr.rel (!%p36_p10) target bundleno = 32 (0x20), region = 35 }
  0x36   : > { %v61_v13 = vsel %vm43_vm0, %v60_v11, %v140_v2 }
  0x37   : > { %v66_v14 = vadd.f32 %v65_v12, %v61_v13 }
  0x39   : > { %v67_v15 = vsel %vm43_vm0, %v66_v14, %v140_v2  }
  0x3a   : > { %v139_v2 = vmov %v67_v15   ;;  %v68_v16 = vmul.f32 (%p36_p10), 0.25, %v67_v15 }
  0x3c   :  { %69 = vst [vmem:[%s184_s2] sm:$0x1] %v68_v16 }
  0x3d   :  { %74 = vsyncpa [#allocation5], 1 }

</bundles_post_ra>
